<compile_context>
chip_gen: v6e
topology: v6e:2x2x1
jax: 0.10.0
libtpu: 0.0.40
codegen_flags: <defaults>
</compile_context>

<pallas_src>
import functools

import jax
import jax.numpy as jnp
from jax.experimental import pallas as pl
from jax.experimental.pallas import tpu as pltpu


def _round_up(x: int, m: int) -> int:
    return (x + m - 1) // m * m


# Keep the resident copy of W small enough that (2 buffers of W) + double-
# buffered x/out tiles stay well under v7x's scoped VMEM (32 MiB of 64 MiB).
_RESIDENT_W_BYTES_MAX = 8 * 1024 * 1024
_VMEM_LIMIT_BYTES = 48 * 1024 * 1024
_MAX_TB = 512        # multiple of 16 (bf16 sublane packing), hits HBM roofline
_TILED_TN = 256      # fills 2x256x256 MXU on v6e / v7x
_TILED_TK = 256


# ---------------------------------------------------------------------------
# Kernels
# ---------------------------------------------------------------------------
def _linear_tanh_resident_kernel(x_ref, w_ref, b_ref, o_ref):
    """1-D grid over batch tiles; whole (K, N_pad) weight resident in VMEM."""
    y = jnp.dot(x_ref[...], w_ref[...], preferred_element_type=jnp.float32)
    o_ref[...] = jnp.tanh(y + b_ref[...]).astype(o_ref.dtype)


def _linear_tanh_tiled_kernel(x_ref, w_ref, b_ref, o_ref):
    """Grid (batch, N, K); K innermost.  Accumulates directly into f32 o_ref
    (no scratch, no zero-fill): first K step assigns, later steps add."""
    k = pl.program_id(2)
    prod = jnp.dot(x_ref[...], w_ref[...], preferred_element_type=jnp.float32)

    @pl.when(k == 0)
    def _():
        o_ref[...] = prod

    @pl.when(k != 0)
    def _():
        o_ref[...] += prod

    @pl.when(k == pl.num_programs(2) - 1)
    def _():
        o_ref[...] = jnp.tanh(o_ref[...] + b_ref[...])


# ---------------------------------------------------------------------------
# One-time parameter preparation (hoisted out of the hot path)
# ---------------------------------------------------------------------------
def prepare_params(weight, bias, *, compute_dtype=jnp.bfloat16):
    """Transform PyTorch-convention Linear params once at model init.

    weight (E_out, E_in) -> transposed bf16 (K, N_pad).  On the resident path
    K == E_in (no K padding needed: full-extent blocks).  On the tiled
    fallback K and N are padded to multiples of 256.
    bias (E_out,) -> f32 (1, N_pad).
    Returns (w_t, b2, e_out, resident).
    """
    e_out, e_in = weight.shape
    itemsize = jnp.dtype(compute_dtype).itemsize

    n_pad = _round_up(e_out, 128)
    resident = e_in * n_pad * itemsize <= _RESIDENT_W_BYTES_MAX
    if resident:
        k_pad = e_in                       # full-dim block, no K padding
    else:
        k_pad = _round_up(e_in, _TILED_TK)
        n_pad = _round_up(e_out, _TILED_TN)

    w_t = (jnp.zeros((k_pad, n_pad), compute_dtype)
           .at[:e_in, :e_out].set(weight.T.astype(compute_dtype)))
    b2 = (jnp.zeros((1, n_pad), jnp.float32)
          .at[0, :e_out].set(bias.astype(jnp.float32)))
    return w_t, b2, e_out, resident


# ---------------------------------------------------------------------------
# Forward: y = tanh(x @ W^T + b)
# ---------------------------------------------------------------------------
@functools.partial(jax.jit, static_argnames=("e_out", "resident", "tb"))
def linear_classifier(x, w_t, b_pad, *, e_out, resident, tb=None):
    B, e_in = x.shape
    K, N = w_t.shape

    # bf16 inputs for the MXU / halved x HBM stream (fuses with upstream ops
    # under jit); accumulation, bias-add and tanh stay in f32.
    xc = x.astype(w_t.dtype)

    if tb is None:
        tb = B if B <= _MAX_TB else _MAX_TB   # full-dim block for small B

    if resident:
        grid = (pl.cdiv(B, tb),)   # ragged tail handled by masked last block
        out = pl.pallas_call(
            _linear_tanh_resident_kernel,
            out_shape=jax.ShapeDtypeStruct((B, N), jnp.float32),
            grid=grid,
            in_specs=[
                pl.BlockSpec((tb, K), lambda i: (i, 0)),   # x tile (bf16)
                pl.BlockSpec((K, N), lambda i: (0, 0)),    # W resident in VMEM
                pl.BlockSpec((1, N), lambda i: (0, 0)),    # bias resident
                # (optional v5e tweak if DMA ever exposed: pipeline_mode=
                #  pl.Buffered(3) on the x spec)
            ],
            out_specs=pl.BlockSpec((tb, N), lambda i: (i, 0)),
            compiler_params=pltpu.CompilerParams(
                dimension_semantics=("parallel",),
                vmem_limit_bytes=_VMEM_LIMIT_BYTES,
            ),
        )(xc, w_t, b_pad)
    else:
        # Tiled fallback for very large E: pad x's K only when required.
        if K != e_in:
            xc = jnp.zeros((B, K), w_t.dtype).at[:, :e_in].set(xc)
        tn, tk = _TILED_TN, _TILED_TK
        grid = (pl.cdiv(B, tb), N // tn, K // tk)
        out = pl.pallas_call(
            _linear_tanh_tiled_kernel,
            out_shape=jax.ShapeDtypeStruct((B, N), jnp.float32),
            grid=grid,
            in_specs=[
                pl.BlockSpec((tb, tk), lambda i, j, k: (i, k)),
                pl.BlockSpec((tk, tn), lambda i, j, k: (k, j)),
                pl.BlockSpec((1, tn), lambda i, j, k: (0, j)),
            ],
            out_specs=pl.BlockSpec((tb, tn), lambda i, j, k: (i, j)),
            compiler_params=pltpu.CompilerParams(
                dimension_semantics=("parallel", "parallel", "arbitrary"),
                vmem_limit_bytes=_VMEM_LIMIT_BYTES,
            ),
        )(xc, w_t, b_pad)

    # Drop lane-padding columns only if any were added (no-op slice otherwise).
    return out if N == e_out else out[:, :e_out]


# ---------------------------------------------------------------------------
# Demo / correctness check
# ---------------------------------------------------------------------------
if __name__ == "__main__":
    encoding_size = 32
    batch = 8

    key = jax.random.PRNGKey(0)
    kx, kw, kb = jax.random.split(key, 3)

    # Deterministic synthetic parameters (mimics nn.Linear's uniform init range).
    bound = 1.0 / (encoding_size ** 0.5)
    x = jax.random.normal(kx, (batch, encoding_size), dtype=jnp.float32)
    weight = jax.random.uniform(kw, (encoding_size, encoding_size),
                                minval=-bound, maxval=bound, dtype=jnp.float32)
    bias = jax.random.uniform(kb, (encoding_size,),
                              minval=-bound, maxval=bound, dtype=jnp.float32)

    # One-time parameter preparation (transpose / cast / pad hoisted out of hot path).
    w_t, b_pad, e_out, resident = prepare_params(weight, bias)

    out = linear_classifier(x, w_t, b_pad, e_out=e_out, resident=resident)
    out = jax.block_until_ready(out)

    # Reference in plain JAX (same semantics as the PyTorch forward).
    # bf16 inputs -> loosened tolerance; accumulation / bias / tanh are f32.
    ref = jnp.tanh(x @ weight.T + bias)
    assert out.shape == (batch, encoding_size)
    assert jnp.allclose(out, ref, atol=5e-2, rtol=5e-2), \
        float(jnp.max(jnp.abs(out - ref)))

    print("KERNEL_OK")
</pallas_src>

<mosaic_0001>
module attributes {stable_mosaic.version = 11 : i64} {
  func.func @_linear_tanh_resident_kernel(%arg0: i32, %arg1: memref<8x32xbf16, #tpu.memory_space<vmem>>, %arg2: memref<32x128xbf16, #tpu.memory_space<vmem>>, %arg3: memref<1x128xf32, #tpu.memory_space<vmem>>, %arg4: memref<8x128xf32, #tpu.memory_space<vmem>>) attributes {dimension_semantics = [#tpu.dimension_semantics<parallel>], iteration_bounds = array<i64: 1>, scalar_prefetch = 0 : i64, scratch_operands = 0 : i64, tpu.core_type = #tpu.core_type<tc>, window_params = [{transform_indices = @transform_0, window_bounds = array<i64: 8, 32>}, {pipeline_mode = #tpu.pipeline_mode<synchronous>, transform_indices = @transform_1, window_bounds = array<i64: 32, 128>}, {pipeline_mode = #tpu.pipeline_mode<synchronous>, transform_indices = @transform_2, window_bounds = array<i64: 1, 128>}, {transform_indices = @transform_3, window_bounds = array<i64: 8, 128>}]} {
    %c0 = arith.constant 0 : index
    %c0_0 = arith.constant 0 : index
    %0 = vector.load %arg1[%c0, %c0_0] : memref<8x32xbf16, #tpu.memory_space<vmem>>, vector<8x32xbf16>
    %c0_1 = arith.constant 0 : index
    %c0_2 = arith.constant 0 : index
    %1 = vector.load %arg2[%c0_1, %c0_2] : memref<32x128xbf16, #tpu.memory_space<vmem>>, vector<32x128xbf16>
    %cst = arith.constant dense<0.000000e+00> : vector<8x128xf32>
    %2 = tpu.matmul %0, %1, %cst {dimension_numbers = #tpu.dot_dimension_numbers<[1], [0], [0], [1], [0, 0, 1, 1], [], []>} : vector<8x32xbf16>, vector<32x128xbf16>, vector<8x128xf32> -> vector<8x128xf32>
    %c0_3 = arith.constant 0 : index
    %c0_4 = arith.constant 0 : index
    %3 = vector.load %arg3[%c0_3, %c0_4] : memref<1x128xf32, #tpu.memory_space<vmem>>, vector<1x128xf32>
    %4 = vector.broadcast %3 : vector<1x128xf32> to vector<8x128xf32>
    %5 = arith.addf %2, %4 : vector<8x128xf32>
    %6 = math.tanh %5 : vector<8x128xf32>
    %c0_5 = arith.constant 0 : index
    %c0_6 = arith.constant 0 : index
    %7 = vector.load %arg4[%c0_5, %c0_6] : memref<8x128xf32, #tpu.memory_space<vmem>>, vector<8x128xf32>
    tpu.vector_store %arg4[%c0_5, %c0_6], %6 {strides = array<i32>} : memref<8x128xf32, #tpu.memory_space<vmem>>, vector<8x128xf32>,
    return
  }
  func.func @transform_0(%arg0: i32) -> (i32, i32) {
    %c0_i32 = arith.constant 0 : i32
    %c0_i32_0 = arith.constant 0 : i32
    return %arg0, %c0_i32 : i32, i32
  }
  func.func @transform_1(%arg0: i32) -> (i32, i32) {
    %c0_i32 = arith.constant 0 : i32
    %c0_i32_0 = arith.constant 0 : i32
    %c0_i32_1 = arith.constant 0 : i32
    return %c0_i32, %c0_i32_0 : i32, i32
  }
  func.func @transform_2(%arg0: i32) -> (i32, i32) {
    %c0_i32 = arith.constant 0 : i32
    %c0_i32_0 = arith.constant 0 : i32
    %c0_i32_1 = arith.constant 0 : i32
    return %c0_i32, %c0_i32_0 : i32, i32
  }
  func.func @transform_3(%arg0: i32) -> (i32, i32) {
    %c0_i32 = arith.constant 0 : i32
    %c0_i32_0 = arith.constant 0 : i32
    return %arg0, %c0_i32 : i32, i32
  }
}

</mosaic_0001>

<bundles_post_ra>
// kernel: linear_classifier.1
= control target key start
LH: loop header
LB: loop body
LE: loop exit
PB: predicated region body
PF: predicated region fallthrough
CT: control target
= control target key end

     0   :  { %8 = vsyncpa [#allocation3], 0  ;;  %s222_s0 = inlined_call_operand.vmem [shape: bf16[8,32], index: 0, kind: input, shape index: {}]   ;;  %s223_s1 = inlined_call_operand.hbm [shape: bf16[32,128], index: 1, kind: input, shape index: {}]   ;;  %s224_s2 = inlined_call_operand.vmem [shape: f32[1,128], index: 2, kind: input, shape index: {}]   ;;  %s225_s3 = inlined_call_operand.hbm [shape: f32[8,128], index: 3, kind: output, shape index: {}]  }
   0x1   :  { %9 = vsyncpa [#allocation4], 0  ;;  %s184_s12 = smov [#allocation2]  }
   0x2   :  { %s17_s13 = sshll.u32 %s184_s12, 4  ;;  %s18_s13 = int_to_ptr.vmem [resolvable:$true] %s17_s13 }
   0x3   :  { %s148_s14 = scalar_lea.vmem %s18_s13, 256  ;;  %p153_p1 = scmp.lt.s32.totalorder %s18_s13, %s18_s13 }
   0x4   :  { %p149_p0 = scmp.ne.s32.totalorder %s18_s13, %s148_s14  ;;  %p154_p2 = scmp.lt.s32.totalorder %s148_s14, %s148_s14 }
   0x6   :  { %p155_p3 = por %p154_p2, %p153_p1 }
   0x8   :  { %p156_p4 = pnand %p155_p3, %p149_p0 }
   0xa   :  { %159 = shalt.err (!%p156_p4)
}
   0xb   :  { %s185_s15 = smov 64   ;;  %s186_s16 = smov 4  }
   0xc   :  { %23 = dma.hbm_to_vmem [thread:$0]  %s223_s1, 256, %s18_s13, [#allocation3], %s185_s15, %s185_s15, %s186_s16  }
   0xd   :  { %180 = dma.done.wait [#allocation3], 256  }
   0xe   :  { %181 = vsyncadd [#allocation3], 4294967040  ;;  %v187_v0 = vmov 0.0   ;;  %vm188_vm0 = vmmov 0   ;;  %v136_v1 = vld [vmem:[#allocation2 + $0x8] sm:$0xff]   ;;  %v137_v2 = vld [vmem:[#allocation2] sm:$0xff]  }
   0xf   :  { %122 = vmatprep.subr.bf16.mxu0 %v187_v0  ;;  %126 = vmatprep.mubr.msk.bf16.mxu0 %vm188_vm0, %v187_v0  ;;  %v30_v3 = vld [vmem:[%s222_s0] sm:$0xf]  ;;  %vm54_vm1 = vcmask 261120   ;;  %s189_s1 = smov [#allocation5]  }
  0x10   :  { %123 = vmatpush3.bf16.msra.mxu0 %v136_v1  ;;  %v115_v4 = vld [vmem:[%s224_s2] ss:$0 sm:$0xff]  ;;  %s106_s23 = sshll.u32 %s189_s1, 4  ;;  %s107_s23 = int_to_ptr.vmem [resolvable:$true] %s106_s23 }
  0x11   :  { %124 = vmatprep.subr.bf16.mxu0 %v187_v0  ;;  %s160_s24 = scalar_lea.vmem %s107_s23, 128  ;;  %p165_p6 = scmp.lt.s32.totalorder %s107_s23, %s107_s23 }
  0x12   :  { %p161_p5 = scmp.ne.s32.totalorder %s107_s23, %s160_s24  ;;  %p166_p7 = scmp.lt.s32.totalorder %s160_s24, %s160_s24 }
  0x14   :  { %125 = vmatpush3.bf16.msra.mxu0 %v137_v2  ;;  %p167_p8 = por %p166_p7, %p165_p6 }
  0x16   :  { %p168_p9 = pnand %p167_p8, %p161_p5 }
  0x17   :  { %127 = vmatmul.mubr.msk.bf16.vlgmr.msra.gmra.mxu0 %vm54_vm1, %v30_v3 }
  0xd7   :  { %v92_v5 = vpop.f32.mrf.mxu0 }
  0xd8   :  { %v93_v6 = vadd.f32 %v115_v4, %v92_v5 }
  0xd9   :  { %v128_v7 = vpop.f32.mrf.mxu0 }
  0xda   :  { %138 = vtanh.f32 %v93_v6 }
  0xdb   :  { %v95_v8 = vpop.f32.mrf.mxu0 }
  0xdd   :  { %v129_v9 = vpop.f32.mrf.mxu0 }
  0xe7   :  { %v139_v10 = vpop.eup %138 }
  0xe8   :  { %99 = vst [vmem:[#allocation5] sm:$0xff] %v139_v10 }
  0xe9   :  { %171 = shalt.err (!%p168_p9)
}
  0xea   :  { %109 = dma.vmem_to_hbm [thread:$0]  %s107_s23, 128, %s225_s3, [#allocation4]  }
  0xeb   :  { %182 = dma.done.wait [#allocation4], 128  }
  0xec   :  { %183 = vsyncadd [#allocation4], 4294967168 }
  0xed   :  { %113 = vsyncpa [#allocation3], 1 }
  0xee   :  { %114 = vsyncpa [#allocation4], 1 }

</bundles_post_ra>
